<compile_context>
chip_gen: v7x
topology: tpu7x:2x2x1
jax: 0.10.0
libtpu: 0.0.40
codegen_flags: <defaults>
</compile_context>

<pallas_src>
import jax
import jax.numpy as jnp
from jax.experimental import pallas as pl
from jax.experimental.pallas import tpu as pltpu


def _value_policy_kernel(x_ref, w2_ref, bias_ref, out_ref):
    # x_ref   : (A*F, bt) VMEM  -- bt independent examples, batch on lanes.
    # w2_ref  : (A*F, 1)  VMEM  -- folded weight column lw[a]*cw[f].
    # bias_ref: (1,)      SMEM  -- folded bias cb*sum(lw) + lb.
    # out_ref : (1, bt)   VMEM  -- lane-dense row of per-example results.
    res = jnp.sum(x_ref[...] * w2_ref[...], axis=0, keepdims=True) + bias_ref[0]
    out_ref[...] = res.astype(out_ref.dtype)


def _as_f32(a):
    return a if a.dtype == jnp.float32 else a.astype(jnp.float32)


def _round_up(n, m):
    return ((n + m - 1) // m) * m


def value_policy_forward_batched(x, conv_w, conv_b, lin_w, lin_b, *, block_b=2048):
    """Evaluate ValuePolicy.forward on B stacked inputs in one pallas_call.

    x:      (A, F, B) -- column b is the module-native input x_b[:, 0, :] with the
                          batch on the minor (lane) axis.  A batch of module inputs
                          x_b of shape (A, 1, F) maps to jnp.stack([x_b[:, 0, :] ...],
                          axis=-1).
    conv_w: (1, 1, F); conv_b: (1,); lin_w: (1, A); lin_b: (1,)
    Returns (B,) float32 with out[b] == Linear(Conv1d(x_b).reshape(1,1,A)).
    """
    A, F, B = x.shape
    AF = A * F

    # --- one-time parameter folding (O(A*F) elements) ---------------------------
    cw = _as_f32(conv_w).reshape(F)
    lw = _as_f32(lin_w).reshape(A)
    w2 = (lw[:, None] * cw[None, :]).reshape(AF, 1)                  # (A*F, 1)
    bias_c = (_as_f32(conv_b).reshape(()) * jnp.sum(lw)
              + _as_f32(lin_b).reshape(())).reshape(1)               # (1,)

    # --- batch-on-lanes input, padded to a lane-aligned tile multiple -----------
    x2d = _as_f32(x).reshape(AF, B)                                  # contiguous reshape
    block_b = max(128, (block_b // 128) * 128)                       # keep lane-aligned
    bt = min(block_b, _round_up(B, 128))
    b_pad = _round_up(B, bt)
    if b_pad != B:
        x2d = jnp.pad(x2d, ((0, 0), (0, b_pad - B)))
    grid = (b_pad // bt,)

    out = pl.pallas_call(
        _value_policy_kernel,
        grid=grid,
        out_shape=jax.ShapeDtypeStruct((1, b_pad), jnp.float32),
        in_specs=[
            pl.BlockSpec((AF, bt), lambda i: (0, i)),                # x batch tile
            pl.BlockSpec((AF, 1), lambda i: (0, 0)),                 # folded weight col
            pl.BlockSpec(memory_space=pltpu.MemorySpace.SMEM),       # folded bias scalar
        ],
        out_specs=pl.BlockSpec((1, bt), lambda i: (0, i)),
        compiler_params=pltpu.CompilerParams(
            # Batch axis is embarrassingly parallel -> v7x can split it over 2 TCs.
            dimension_semantics=("parallel",),
        ),
        cost_estimate=pl.CostEstimate(
            flops=2 * AF * b_pad,
            transcendentals=0,
            bytes_accessed=(x2d.size + w2.size + bias_c.size + b_pad) * 4,
        ),
    )(x2d, w2, bias_c)
    return out.reshape(b_pad)[:B]


def value_policy_forward(x, conv_w, conv_b, lin_w, lin_b):
    """Module-exact forward: x (A, 1, F) -> (1, 1, 1).

    Per the performance review, a single 512-byte example is pure pallas_call launch
    overhead, so this path is plain jnp (fusable by XLA); the Pallas kernel is the
    batched entry point above.
    """
    A, C, F = x.shape
    assert C == 1, "Conv1d has in_channels=1"
    cw = _as_f32(conv_w).reshape(F)
    lw = _as_f32(lin_w).reshape(A)
    w_pref = jnp.einsum("af,f->a", _as_f32(x).reshape(A, F), cw) + _as_f32(conv_b).reshape(())
    res = jnp.dot(w_pref, lw) + _as_f32(lin_b).reshape(())
    return res.reshape(1, 1, 1)


def _reference_forward_batched(x, conv_w, conv_b, lin_w, lin_b):
    # Pure-JAX reference for the batched layout x: (A, F, B).
    A, F, B = x.shape
    w_pref = jnp.einsum("afb,f->ab", x, conv_w.reshape(F)) + conv_b.reshape(())   # (A, B)
    res = jnp.einsum("ab,a->b", w_pref, lin_w.reshape(A)) + lin_b.reshape(())     # (B,)
    return res


if __name__ == "__main__":
    num_features = 16
    num_actions = 8
    batch = 300                     # deliberately not a multiple of 128 -> exercises padding

    key = jax.random.PRNGKey(0)
    kx, kcw, kcb, klw, klb = jax.random.split(key, 5)

    # Batched inputs: batch on the minor axis, (A, F, B).
    x_batch = jax.random.normal(
        kx, (num_actions, num_features, batch), dtype=jnp.float32)

    # Deterministic params mimicking PyTorch's default uniform(-1/sqrt(fan_in), +...).
    k_conv = 1.0 / jnp.sqrt(jnp.float32(1 * num_features))
    k_lin = 1.0 / jnp.sqrt(jnp.float32(num_actions))
    conv_w = jax.random.uniform(kcw, (1, 1, num_features), jnp.float32, -k_conv, k_conv)
    conv_b = jax.random.uniform(kcb, (1,), jnp.float32, -k_conv, k_conv)
    lin_w = jax.random.uniform(klw, (1, num_actions), jnp.float32, -k_lin, k_lin)
    lin_b = jax.random.uniform(klb, (1,), jnp.float32, -k_lin, k_lin)

    # Batched Pallas kernel (small block_b here so the test runs a multi-step grid:
    # B=300 -> padded to 384 -> grid=(3,)).
    out_b = jax.block_until_ready(
        value_policy_forward_batched(x_batch, conv_w, conv_b, lin_w, lin_b, block_b=128))
    ref_b = _reference_forward_batched(x_batch, conv_w, conv_b, lin_w, lin_b)
    assert out_b.shape == (batch,)
    assert jnp.allclose(out_b, ref_b, atol=1e-5, rtol=1e-5), (out_b[:4], ref_b[:4])

    # Same kernel with the default (large) tile size.
    out_b2 = jax.block_until_ready(
        value_policy_forward_batched(x_batch, conv_w, conv_b, lin_w, lin_b))
    assert jnp.allclose(out_b2, ref_b, atol=1e-5, rtol=1e-5)

    # Module-exact single forward: x (A, 1, F) -> (1, 1, 1)  (plain-jnp fast path).
    x_single = x_batch[:, :, 0].reshape(num_actions, 1, num_features)
    out_s = jax.block_until_ready(
        value_policy_forward(x_single, conv_w, conv_b, lin_w, lin_b))
    assert out_s.shape == (1, 1, 1)
    assert jnp.allclose(out_s.reshape(()), ref_b[0], atol=1e-5, rtol=1e-5), (out_s, ref_b[0])

    print("KERNEL_OK")
</pallas_src>

<mosaic_0001>
module attributes {stable_mosaic.version = 11 : i64} {
  func.func @_value_policy_kernel(%arg0: i32, %arg1: memref<128x128xf32, #tpu.memory_space<vmem>>, %arg2: memref<128x1xf32, #tpu.memory_space<vmem>>, %arg3: memref<1xf32, #tpu.memory_space<smem>>, %arg4: memref<1x128xf32, #tpu.memory_space<vmem>>) attributes {dimension_semantics = [#tpu.dimension_semantics<parallel>], iteration_bounds = array<i64: 3>, scalar_prefetch = 0 : i64, scratch_operands = 0 : i64, tpu.core_type = #tpu.core_type<tc>, window_params = [{transform_indices = @transform_0, window_bounds = array<i64: 128, 128>}, {pipeline_mode = #tpu.pipeline_mode<synchronous>, transform_indices = @transform_1, window_bounds = array<i64: 128, 1>}, {transform_indices = @transform_2, window_bounds = array<i64: 1>}, {transform_indices = @transform_3, window_bounds = array<i64: 1, 128>}]} {
    %c0 = arith.constant 0 : index
    %c0_0 = arith.constant 0 : index
    %0 = vector.load %arg1[%c0, %c0_0] : memref<128x128xf32, #tpu.memory_space<vmem>>, vector<128x128xf32>
    %c0_1 = arith.constant 0 : index
    %c0_2 = arith.constant 0 : index
    %1 = vector.load %arg2[%c0_1, %c0_2] : memref<128x1xf32, #tpu.memory_space<vmem>>, vector<128x1xf32>
    %2 = vector.broadcast %1 : vector<128x1xf32> to vector<128x128xf32>
    %3 = arith.mulf %0, %2 : vector<128x128xf32>
    %cst = arith.constant dense<0.000000e+00> : vector<128xf32>
    %4 = vector.multi_reduction <add>, %3, %cst [0] : vector<128x128xf32> to vector<128xf32>
    %5 = vector.shape_cast %4 : vector<128xf32> to vector<1x128xf32>
    %c0_3 = arith.constant 0 : index
    %6 = memref.load %arg3[%c0_3] : memref<1xf32, #tpu.memory_space<smem>>
    %7 = vector.broadcast %6 : f32 to vector<1x128xf32>
    %8 = arith.addf %5, %7 : vector<1x128xf32>
    %c0_4 = arith.constant 0 : index
    %c0_5 = arith.constant 0 : index
    %9 = vector.load %arg4[%c0_4, %c0_5] : memref<1x128xf32, #tpu.memory_space<vmem>>, vector<1x128xf32>
    tpu.vector_store %arg4[%c0_4, %c0_5], %8 {strides = array<i32>} : memref<1x128xf32, #tpu.memory_space<vmem>>, vector<1x128xf32>,
    return
  }
  func.func @transform_0(%arg0: i32) -> (i32, i32) {
    %c0_i32 = arith.constant 0 : i32
    %c0_i32_0 = arith.constant 0 : i32
    return %c0_i32, %arg0 : i32, i32
  }
  func.func @transform_1(%arg0: i32) -> (i32, i32) {
    %c0_i32 = arith.constant 0 : i32
    %c0_i32_0 = arith.constant 0 : i32
    %c0_i32_1 = arith.constant 0 : i32
    return %c0_i32, %c0_i32_0 : i32, i32
  }
  func.func @transform_2(%arg0: i32) -> i32 {
    %c0_i32 = arith.constant 0 : i32
    %c0_i32_0 = arith.constant 0 : i32
    return %c0_i32 : i32
  }
  func.func @transform_3(%arg0: i32) -> (i32, i32) {
    %c0_i32 = arith.constant 0 : i32
    %c0_i32_0 = arith.constant 0 : i32
    return %c0_i32, %arg0 : i32, i32
  }
}

</mosaic_0001>

<bundles_post_ra>
// kernel: tpu_custom_call.1
= control target key start
LH: loop header
LB: loop body
LE: loop exit
PB: predicated region body
PF: predicated region fallthrough
CT: control target
= control target key end

     0   :  { %s836_s0 = inlined_call_operand.hbm [shape: f32[128,384], index: 0, kind: input, shape index: {}]   ;;  %s837_s1 = inlined_call_operand.vmem [shape: f32[128,1], index: 1, kind: input, shape index: {}]   ;;  %s838_s2 = inlined_call_operand.<no memory space> [shape: f32[1], index: 2, kind: input, shape index: {}]   ;;  %s839_s3 = inlined_call_operand.hbm [shape: f32[1,384], index: 3, kind: output, shape index: {}]  }
   0x1   :  { %8 = sst [smem:[#allocation2]] %s838_s2 }
   0x2   :  { %9 = vsyncpa [#allocation4], 0 }
   0x3   :  { %11 = vsyncpa [#allocation4 + $0x1], 0 }
   0x4   :  { %12 = vsyncpa [#allocation5], 0 }
   0x5   :  { %14 = vsyncpa [#allocation5 + $0x1], 0  ;;  %s609_s14 = smov 0   ;;  %s611_s15 = smov 0  }
   0x6   :  { %s613_s16 = smov 0   ;;  %s615_s17 = smov 0  }
   0x7 LB: > { %s630_s2 = sadd.s32 4294967295, %s578_s17   ;;  %s420_s18 = sadd.s32 4294967294, %s578_s17   ;;  %s578_s17 = sphi %s615_s17, %s852_s17   ;;  %s574_s16 = sphi %s613_s16, %s851_s16   ;;  %s570_s15 = sphi %s611_s15, %s850_s15   ;;  %s566_s14 = sphi %s609_s14, %s849_s14  }
   0x8   : > { %s634_s19 = sadd.s32 1, %s578_s17   ;;  %s27_s20 = sadd.s32 1, %s574_s16 }
   0x9   : > { %s24_s21 = ssub.s32 %s578_s17, %s634_s19  ;;  %p34_p0 = scmp.ne.s32.totalorder %s574_s16, %s570_s15 }
   0xa   : > { %p25_p1 = scmp.eq.s32.totalorder %s24_s21, 0  ;;  %p35_p2 = scmp.eq.s32.totalorder %s578_s17, 0 }
   0xb   : > { %p40_p3 = scmp.ne.s32.totalorder %s570_s15, %s566_s14  ;;  %p41_p4 = scmp.eq.s32.totalorder %s630_s2, 0 }
   0xc   : > { %s646_s22 = scalar_select %p25_p1, %s574_s16, %s27_s20  }
   0xd   : > { %p648_p5 = por %p35_p2, %p34_p0  ;;  %p652_p6 = por %p41_p4, %p40_p3 }
   0xe   : > { %p106_p7 = scmp.eq.s32.totalorder %s630_s2, 2  ;;  %p112_p8 = scmp.eq.s32.totalorder %s420_s18, 2 }
   0xf   : > { %p442_p9 = scmp.lt.s32.totalorder %s578_s17, 3  ;;  %s138_s27 = sand.u32 1, %s574_s16  }
  0x10   : > { %p658_p10 = por %p106_p7, %p34_p0  ;;  %p662_p11 = por %p112_p8, %p40_p3 }
  0x11   : > { %s424_s28 = sshll.u32 %s578_s17, 7  ;;  %s423_s29 = sshll.u32 %s138_s27, 7 }
  0x12   : > { %s843_s25 = scalar_select %p658_p10, 1, 0 }
  0x13   : > { %s844_s26 = scalar_select %p662_p11, 1, 0 }
  0x14   : > { %s671_s5 = scalar_lea.hbm %s836_s0, %s424_s28  ;;  %s142_s6 = scalar_lea.vmem [#allocation3], %s423_s29 }
  0x15   : > { %s148_s7 = sshll.u32 %s142_s6, 4  ;;  %p675_p12 = pnand %p442_p9, %p648_p5  ;;  %s679_s7 = int_to_ptr.vmem [resolvable:$true] %s148_s7 }
  0x16   : > { %s682_s9 = scalar_lea.sflag [#allocation4], %s138_s27  ;;  %s482_s10 = scalar_lea.hbm %s671_s5, 2048 }
  0x17   : > { %p483_p0 = scmp.ne.s32.totalorder %s671_s5, %s482_s10  ;;  %p484_p1 = pneg %p675_p12 }
  0x18   : > { %s487_s13 = scalar_lea.hbm %s836_s0, 6144  ;;  %p488_p4 = scmp.lt.u32.totalorder %s671_s5, %s836_s0 }
  0x19   : > { %p485_p2 = pnand %p484_p1, %p483_p0  ;;  %p489_p5 = scmp.lt.u32.totalorder %s487_s13, %s482_s10 }
  0x1a   : > { %p491_p8 = scmp.lt.u32.totalorder %s482_s10, %s671_s5 }
  0x1b   : > { %p486_p3 = pneg %p485_p2  ;;  %p490_p7 = por %p489_p5, %p488_p4 }
  0x1d   : > { %p492_p9 = por %p491_p8, %p490_p7 }
  0x1f   : > { %p493_p13 = pnand %p492_p9, %p486_p3 }
  0x21   : > { %496 = shalt.err (!%p493_p13)
}
  0x22   : > { %s497_s21 = scalar_lea.vmem %s679_s7, 2048  ;;  %s580_s23 = smov [#allocation3]  }
  0x23   : > { %p498_p0 = scmp.ne.s32.totalorder %s679_s7, %s497_s21  ;;  %s502_s27 = sshll.u32 %s580_s23, 4  ;;  %s503_s27 = int_to_ptr.vmem [resolvable:$false] %s502_s27 }
  0x24   : > { %s504_s28 = scalar_lea.vmem %s503_s27, 4096  ;;  %p505_p10 = scmp.lt.s32.totalorder %s679_s7, %s503_s27 }
  0x25   : > { %p500_p2 = pnand %p498_p0, %p484_p1  ;;  %p506_p4 = scmp.lt.s32.totalorder %s504_s28, %s497_s21 }
  0x27   : > { %p501_p11 = pneg %p500_p2  ;;  %p507_p5 = por %p506_p4, %p505_p10 }
  0x29   : > { %p508_p7 = pnand %p507_p5, %p501_p11 }
  0x2b   : > { %511 = shalt.err (!%p508_p7)
}
  0x2c   : > { %s581_s29 = smov 384   ;;  %s582_s30 = smov 128  }
  0x2d   : > { %s583_s4 = smov 8   ;;  %p156_p13 = scmp.lt.s32.totalorder %s578_s17, 4 }
  0x2e   : > { %437 = dma.hbm_to_vmem [thread:$0]  (!%p675_p12), %s671_s5, 2048, %s679_s7, %s682_s9, %s581_s29, %s582_s30, %s583_s4  }
  0x2f   : > { %p846_p1 = scmp.ge.s32.totalorder %s578_s17, 1 }
  0x31   : > { %p157_p3 = pnand %p846_p1, %p156_p13 }
  0x32   : > { %s714_s6 = sand.u32 (!%p157_p3), 1, %s570_s15  }
  0x33   : > { %160 = sbr.rel (%p157_p3) target bundleno = 253 (0xfd), region = 32  ;;  %s426_s10 = sshll.u32 (!%p157_p3), %s714_s6, 7 }
  0x34   : > { %s163_s11 = scalar_lea.sflag (!%p157_p3), [#allocation4], %s714_s6  ;;  %s718_s12 = scalar_lea.vmem (!%p157_p3), [#allocation3], %s426_s10 }
  0x3a   : > { %557 = dma.done.wait (%p652_p6), %s163_s11, 2048  }
  0x3b   : > { %559 = vsyncadd (%p652_p6), %s163_s11, 4294965248  ;;  %v584_v0 = vmov 0   ;;  %v206_v1 = vld [vmem:[%s837_s1 + $0x10] sm:$0xff]  ;;  %v204_v2 = vld [vmem:[%s837_s1] sm:$0xff]  ;;  %s337_s10 = sld [smem:[#allocation2]]  ;;  %s427_s11 = sshll.u32 %s630_s2, 4 }
  0x3c   : > { %481 = vset.pattern.permute.xlu1 %v584_v0  ;;  %480 = vset.pattern.permute.xlu0 %v584_v0  ;;  %v207_v3 = vld [vmem:[%s837_s1 + $0x18] sm:$0xff]  ;;  %v205_v4 = vld [vmem:[%s837_s1 + $0x8] sm:$0xff]  ;;  %v208_v6 = vld [vmem:[%s837_s1 + $0x20] sm:$0xff]  ;;  %s187_s5 = scalar_lea.vmem [#allocation6], %s714_s6  ;;  %s793_s9 = scalar_lea.hbm %s839_s3, %s427_s11 }
  0x3d   : > { %232 = vperm.xlu1 %481, %v206_v1   ;;  %222 = vperm.xlu0 %480, %v204_v2   ;;  %v209_v5 = vld [vmem:[%s837_s1 + $0x28] sm:$0xff]  ;;  %v211_v7 = vld [vmem:[%s837_s1 + $0x38] sm:$0xff]  ;;  %v210_v8 = vld [vmem:[%s837_s1 + $0x30] sm:$0xff]  ;;  %s354_s7 = sshll.u32 %s187_s5, 4  ;;  %s342_s13 = scalar_lea.sflag [#allocation5], %s714_s6  ;;  %s795_s7 = int_to_ptr.vmem [resolvable:$true] %s354_s7 }
  0x3e   : > { %v213_v9 = vld [vmem:[%s837_s1 + $0x48] sm:$0xff]  ;;  %v212_v10 = vld [vmem:[%s837_s1 + $0x40] sm:$0xff]  ;;  %v215_v11 = vld [vmem:[%s837_s1 + $0x58] sm:$0xff]  ;;  %s512_s18 = scalar_lea.vmem %s795_s7, 16  ;;  %p847_p10 = scmp.ne.s32.totalorder %s843_s25, 0 }
  0x3f   : > { %v214_v12 = vld [vmem:[%s837_s1 + $0x50] sm:$0xff]  ;;  %v217_v13 = vld [vmem:[%s837_s1 + $0x68] sm:$0xff]  ;;  %v216_v14 = vld [vmem:[%s837_s1 + $0x60] sm:$0xff]  ;;  %p513_p6 = scmp.ne.s32.totalorder %s795_s7, %s512_s18  ;;  %s585_s2 = smov [#allocation6]  }
  0x40   : > { %v219_v15 = vld [vmem:[%s837_s1 + $0x78] sm:$0xff]  ;;  %v218_v16 = vld [vmem:[%s837_s1 + $0x70] sm:$0xff]  ;;  %v188_v19 = vld [vmem:[%s718_s12] sm:$0xff]  ;;  %s516_s20 = sshll.u32 %s585_s2, 4  ;;  %s517_s20 = int_to_ptr.vmem [resolvable:$false] %s516_s20 }
  0x41   : > { %237 = vperm.xlu1 %481, %v207_v3   ;;  %227 = vperm.xlu0 %480, %v205_v4   ;;  %v189_v20 = vld [vmem:[%s718_s12 + $0x8] sm:$0xff]  ;;  %v190_v21 = vld [vmem:[%s718_s12 + $0x10] sm:$0xff]  ;;  %v191_v26 = vld [vmem:[%s718_s12 + $0x18] sm:$0xff]  ;;  %p514_p11 = pnand %p513_p6, %p847_p10  ;;  %s518_s24 = scalar_lea.vmem %s517_s20, 32 }
  0x42   : > { %v192_v31 = vld [vmem:[%s718_s12 + $0x20] sm:$0xff]  ;;  %v193_v34 = vld [vmem:[%s718_s12 + $0x28] sm:$0xff]  ;;  %v194_v39 = vld [vmem:[%s718_s12 + $0x30] sm:$0xff]  ;;  %p519_p8 = scmp.lt.s32.totalorder %s795_s7, %s517_s20  ;;  %p520_p9 = scmp.lt.s32.totalorder %s518_s24, %s512_s18 }
  0x43   : > { %v195_v42 = vld [vmem:[%s718_s12 + $0x38] sm:$0xff]  ;;  %v196_v47 = vld [vmem:[%s718_s12 + $0x40] sm:$0xff]  ;;  %v197_v50 = vld [vmem:[%s718_s12 + $0x48] sm:$0xff]  ;;  %p515_p12 = pneg %p514_p11 }
  0x44   : > { %v198_v55 = vld [vmem:[%s718_s12 + $0x50] sm:$0xff]  ;;  %v199_v58 = vld [vmem:[%s718_s12 + $0x58] sm:$0xff]  ;;  %v200_v63 = vld [vmem:[%s718_s12 + $0x60] sm:$0xff]  ;;  %p521_p0 = por %p520_p9, %p519_p8 }
  0x45   : > { %247 = vperm.xlu1 %481, %v209_v5   ;;  %242 = vperm.xlu0 %480, %v208_v6   ;;  %v201_v2 = vld [vmem:[%s718_s12 + $0x68] sm:$0xff]  ;;  %v202_v6 = vld [vmem:[%s718_s12 + $0x70] sm:$0xff] }
  0x46   : > { %p522_p2 = pnand %p521_p0, %p515_p12 }
  0x49   : > { %257 = vperm.xlu1 %481, %v211_v7   ;;  %252 = vperm.xlu0 %480, %v210_v8  }
  0x4d   : > { %267 = vperm.xlu1 %481, %v213_v9   ;;  %262 = vperm.xlu0 %480, %v212_v10   ;;  %v203_v10 = vld [vmem:[%s718_s12 + $0x78] sm:$0xff] }
  0x51   : > { %277 = vperm.xlu1 %481, %v215_v11   ;;  %272 = vperm.xlu0 %480, %v214_v12  }
  0x55   : > { %287 = vperm.xlu1 %481, %v217_v13   ;;  %282 = vperm.xlu0 %480, %v216_v14  }
  0x59   : > { %297 = vperm.xlu1 %481, %v219_v15   ;;  %292 = vperm.xlu0 %480, %v218_v16  }
  0xbc   : > { %v233_v17 = vpop.permute.xlu1 %232  ;;  %v223_v18 = vpop.permute.xlu0 %222 }
  0xbd   : > { %v300_v24 = vmul.f32 %v223_v18, %v188_v19  ;;  %v302_v27 = vmul.f32 %v233_v17, %v190_v21  ;;  %v338_v21 = vstv %s337_s10 }
  0xc0   : > { %v238_v22 = vpop.permute.xlu1 %237  ;;  %v228_v23 = vpop.permute.xlu0 %227 }
  0xc1   : > { %v301_v25 = vmul.f32 %v228_v23, %v189_v20  ;;  %v303_v32 = vmul.f32 %v238_v22, %v191_v26 }
  0xc3   : > { %v316_v28 = vadd.f32 %v301_v25, %v300_v24 }
  0xc4   : > { %v248_v29 = vpop.permute.xlu1 %247  ;;  %v243_v30 = vpop.permute.xlu0 %242 }
  0xc5   : > { %v317_v33 = vadd.f32 %v316_v28, %v302_v27  ;;  %v304_v35 = vmul.f32 %v243_v30, %v192_v31  ;;  %v305_v40 = vmul.f32 %v248_v29, %v193_v34 }
  0xc7   : > { %v318_v36 = vadd.f32 %v317_v33, %v303_v32 }
  0xc8   : > { %v258_v37 = vpop.permute.xlu1 %257  ;;  %v253_v38 = vpop.permute.xlu0 %252 }
  0xc9   : > { %v319_v41 = vadd.f32 %v318_v36, %v304_v35  ;;  %v306_v43 = vmul.f32 %v253_v38, %v194_v39  ;;  %v307_v48 = vmul.f32 %v258_v37, %v195_v42 }
  0xcb   : > { %v320_v44 = vadd.f32 %v319_v41, %v305_v40 }
  0xcc   : > { %v268_v45 = vpop.permute.xlu1 %267  ;;  %v263_v46 = vpop.permute.xlu0 %262 }
  0xcd   : > { %v321_v49 = vadd.f32 %v320_v44, %v306_v43  ;;  %v308_v51 = vmul.f32 %v263_v46, %v196_v47  ;;  %v309_v56 = vmul.f32 %v268_v45, %v197_v50 }
  0xcf   : > { %v322_v52 = vadd.f32 %v321_v49, %v307_v48 }
  0xd0   : > { %v278_v53 = vpop.permute.xlu1 %277  ;;  %v273_v54 = vpop.permute.xlu0 %272 }
  0xd1   : > { %v323_v57 = vadd.f32 %v322_v52, %v308_v51  ;;  %v310_v59 = vmul.f32 %v273_v54, %v198_v55  ;;  %v311_v0 = vmul.f32 %v278_v53, %v199_v58 }
  0xd3   : > { %v324_v60 = vadd.f32 %v323_v57, %v309_v56 }
  0xd4   : > { %v288_v61 = vpop.permute.xlu1 %287  ;;  %v283_v62 = vpop.permute.xlu0 %282 }
  0xd5   : > { %v325_v1 = vadd.f32 %v324_v60, %v310_v59  ;;  %v312_v3 = vmul.f32 %v283_v62, %v200_v63  ;;  %v313_v7 = vmul.f32 %v288_v61, %v201_v2 }
  0xd7   : > { %v326_v4 = vadd.f32 %v325_v1, %v311_v0 }
  0xd8   : > { %v293_v5 = vpop.permute.xlu0 %292  ;;  %v298_v9 = vpop.permute.xlu1 %297 }
  0xd9   : > { %v327_v8 = vadd.f32 %v326_v4, %v312_v3  ;;  %v314_v11 = vmul.f32 %v293_v5, %v202_v6  ;;  %v315_v13 = vmul.f32 %v298_v9, %v203_v10 }
  0xdb   : > { %v328_v12 = vadd.f32 %v327_v8, %v313_v7 }
  0xdd   : > { %v329_v14 = vadd.f32 %v328_v12, %v314_v11 }
  0xdf   : > { %v330_v15 = vadd.f32 %v329_v14, %v315_v13 }
  0xe1   : > { %v331_v16 = vrot.slane %v330_v15, 4 }
  0xe3   : > { %v332_v17 = vadd.f32 %v331_v16, %v330_v15 }
  0xe5   : > { %v333_v18 = vrot.slane %v332_v17, 2 }
  0xe7   : > { %v334_v19 = vadd.f32 %v333_v18, %v332_v17 }
  0xe9   : > { %v335_v20 = vrot.slane %v334_v19, 1 }
  0xeb   : > { %v336_v22 = vadd.f32 %v335_v20, %v334_v19 }
  0xed   : > { %v339_v23 = vadd.f32 %v338_v21, %v336_v22 }
  0xef   : > { %340 = vst [vmem:[%s187_s5] sm:$0x1] %v339_v23 }
  0xf0   : > { %525 = shalt.err (!%p522_p2)
}
  0xf1   : > { %s526_s6 = scalar_lea.hbm %s793_s9, 16  ;;  %s530_s27 = scalar_lea.hbm %s839_s3, 48 }
  0xf2   : > { %p527_p4 = scmp.ne.s32.totalorder %s793_s9, %s526_s6  ;;  %p531_p13 = scmp.lt.u32.totalorder %s793_s9, %s839_s3 }
  0xf3   : > { %p532_p1 = scmp.lt.u32.totalorder %s530_s27, %s526_s6  ;;  %p534_p6 = scmp.lt.u32.totalorder %s526_s6, %s793_s9 }
  0xf4   : > { %p528_p5 = pnand %p527_p4, %p847_p10 }
  0xf5   : > { %p533_p3 = por %p532_p1, %p531_p13 }
  0xf6   : > { %p529_p7 = pneg %p528_p5 }
  0xf7   : > { %p535_p11 = por %p534_p6, %p533_p3 }
  0xf9   : > { %p536_p12 = pnand %p535_p11, %p529_p7 }
  0xfb   : > { %539 = shalt.err (!%p536_p12)
}
  0xfc   : > { %432 = dma.vmem_to_hbm [thread:$0]  (%p847_p10), %s795_s7, 16, %s793_s9, %s342_s13  }
  0xfd PF: > { %p443_p8 = scmp.ge.s32.totalorder %s578_s17, 2  ;;  %s366_s30 = sand.u32 1, %s566_s14  }
  0xfe   : > { %p848_p9 = scmp.ne.s32.totalorder %s844_s26, 0  ;;  %s367_s4 = scalar_lea.sflag [#allocation5], %s366_s30 }
 0x100   : > { %p439_p0 = pnand %p443_p8, %p848_p9 }
 0x102   : > { %561 = dma.done.wait (!%p439_p0), %s367_s4, 16  }
 0x103   : > { %563 = vsyncadd (!%p439_p0), %s367_s4, 4294967280  ;;  %p17_p2 = scmp.ge.s32.totalorder %s634_s19, 5   ;;  %s849_s14 = smov %s570_s15 }
 0x104   : > { %s850_s15 = smov %s574_s16  ;;  %s851_s16 = smov %s646_s22 }
 0x105   : > { %s852_s17 = smov %s634_s19  ;;  %19 = sbr.rel (!%p17_p2) target bundleno = 7 (0x7), region = 77 }
 0x10c   :  { %371 = vsyncpa [#allocation4], 1 }
 0x10d   :  { %373 = vsyncpa [#allocation4 + $0x1], 1 }
 0x10e   :  { %374 = vsyncpa [#allocation5], 1 }
 0x10f   :  { %376 = vsyncpa [#allocation5 + $0x1], 1 }

</bundles_post_ra>
